<compile_context>
chip_gen: v7x
topology: tpu7x:2x2x1
jax: 0.10.0
libtpu: 0.0.40
codegen_flags: <defaults>
</compile_context>

<pallas_src>
import jax
import jax.numpy as jnp
from jax.experimental import pallas as pl
from jax.experimental.pallas import tpu as pltpu


# --------------------------------------------------------------------------- #
# Kernels
# --------------------------------------------------------------------------- #
def _tag_encoder_resident_kernel(x_ref, w1_ref, s1_ref, t1_ref,
                                 w2_ref, s2_ref, t2_ref, out_ref):
    """Grid = (batch_tiles,). Entire (padded) W1 / W2 are VMEM-resident."""
    acc = jnp.dot(x_ref[...], w1_ref[...], preferred_element_type=jnp.float32)
    h = jnp.maximum(acc * s1_ref[...] + t1_ref[...], 0.0)
    y = jnp.dot(h.astype(w2_ref.dtype), w2_ref[...],
                preferred_element_type=jnp.float32)
    out_ref[...] = jnp.maximum(y * s2_ref[...] + t2_ref[...],
                               0.0).astype(out_ref.dtype)


def _tag_encoder_streamed_kernel(x_ref, w1_ref, s1_ref, t1_ref,
                                 w2_ref, s2_ref, t2_ref, out_ref, acc_ref):
    """Grid = (batch_tiles, vocab_tiles); vocab is the reduction axis."""
    k = pl.program_id(1)

    @pl.when(k == 0)
    def _():
        acc_ref[...] = jnp.zeros_like(acc_ref)

    # Layer-1 partial matmul on the MXU, f32 accumulation in VMEM scratch.
    acc_ref[...] += jnp.dot(x_ref[...], w1_ref[...],
                            preferred_element_type=jnp.float32)

    @pl.when(k == pl.num_programs(1) - 1)
    def _():
        # Finalize: folded bias+BN (scale/shift) + ReLU, then layer 2.
        h = jnp.maximum(acc_ref[...] * s1_ref[...] + t1_ref[...], 0.0)
        y = jnp.dot(h.astype(w2_ref.dtype), w2_ref[...],
                    preferred_element_type=jnp.float32)
        out_ref[...] = jnp.maximum(y * s2_ref[...] + t2_ref[...],
                                   0.0).astype(out_ref.dtype)


# --------------------------------------------------------------------------- #
# Host-side helpers
# --------------------------------------------------------------------------- #
def _round_up(n, m):
    return (n + m - 1) // m * m


def _fold_bn(bias, gamma, beta, mean, var, eps):
    """Fold Linear bias + eval-mode BatchNorm into y = (x@W)*scale + shift."""
    scale = gamma * jax.lax.rsqrt(var + eps)
    shift = (bias - mean) * scale + beta
    return scale, shift


def _pick_tile_b(B):
    """Batch tile: as close to 128 as useful, but keep >=2 tiles (v7x cores)."""
    Bp8 = _round_up(B, 8)
    n_tiles = -(-Bp8 // 128)
    tb = min(128, _round_up(-(-Bp8 // n_tiles), 8))
    if n_tiles < 2 and Bp8 > 8:
        tb = max(8, _round_up(Bp8 // 2, 8))
    Bp = _round_up(Bp8, tb)
    return tb, Bp


def _vmem_limit(est_bytes):
    # >=32 MiB (v5e scoped default is 16 MiB), <=48 MiB (v7x has 64 MiB VMEM).
    return int(min(48 * 2 ** 20, max(32 * 2 ** 20, 2 * est_bytes)))


def prepare_tag_encoder_params(w1, b1, g1, be1, m1, v1,
                               w2, b2, g2, be2, m2, v2, *, eps=1e-5):
    """One-time (model-load) fold of bias+BN, padding, and bf16 cast.

    Hoisted out of the per-call path so the W1 stream is not re-padded /
    re-written on every forward call.
    """
    V, H = w1.shape
    E = w2.shape[1]
    s1, t1 = _fold_bn(b1, g1, be1, m1, v1, eps)
    s2, t2 = _fold_bn(b2, g2, be2, m2, v2, eps)

    # Zero padding is exact: padded vocab columns / hidden features contribute
    # 0 through both layers.
    Vp = _round_up(V, 128)
    Hp = _round_up(H, 128)
    Ep = _round_up(E, 128)

    f32, bf16 = jnp.float32, jnp.bfloat16
    w1p = jnp.zeros((Vp, Hp), bf16).at[:V, :H].set(w1.astype(bf16))
    w2p = jnp.zeros((Hp, Ep), bf16).at[:H, :E].set(w2.astype(bf16))
    s1p = jnp.zeros((1, Hp), f32).at[0, :H].set(s1.astype(f32))
    t1p = jnp.zeros((1, Hp), f32).at[0, :H].set(t1.astype(f32))
    s2p = jnp.zeros((1, Ep), f32).at[0, :E].set(s2.astype(f32))
    t2p = jnp.zeros((1, Ep), f32).at[0, :E].set(t2.astype(f32))

    return {"w1": w1p, "s1": s1p, "t1": t1p,
            "w2": w2p, "s2": s2p, "t2": t2p,
            "dims": (V, H, E), "padded": (Vp, Hp, Ep)}


def tag_encoder_apply(params, x, *, max_resident_w1_bytes=16 * 2 ** 20):
    """x: [B, V] float32. Returns [B, E] float32 (eval-mode forward)."""
    B, V = x.shape
    Vd, _, Ed = params["dims"]
    assert V == Vd, "vocab size mismatch with prepared params"
    Vp, Hp, Ep = params["padded"]
    w1p, s1p, t1p = params["w1"], params["s1"], params["t1"]
    w2p, s2p, t2p = params["w2"], params["s2"], params["t2"]

    tile_b, Bp = _pick_tile_b(B)
    # Only x is padded per call (batch + vocab), in bf16 to halve DMA bytes.
    xp = jnp.zeros((Bp, Vp), jnp.bfloat16).at[:B, :V].set(x.astype(jnp.bfloat16))

    cost = pl.CostEstimate(
        flops=2 * Bp * Vp * Hp + 2 * Bp * Hp * Ep,
        transcendentals=0,
        bytes_accessed=(2 * (xp.size + w1p.size + w2p.size)
                        + 4 * (s1p.size + t1p.size + s2p.size + t2p.size)
                        + 4 * Bp * Ep),
    )

    w1_bytes = Vp * Hp * 2  # bf16

    if w1_bytes <= max_resident_w1_bytes:
        # --- Resident path: W1 lives in VMEM, no K reduction at all. -------- #
        grid = (Bp // tile_b,)
        vmem_est = (2 * (tile_b * Vp * 2 + tile_b * Ep * 4)   # x / out tiles
                    + 2 * w1_bytes + 2 * Hp * Ep * 2           # weights
                    + 8 * (Hp + Ep)                            # scale/shift
                    + tile_b * Hp * 4)                         # h intermediate
        out_padded = pl.pallas_call(
            _tag_encoder_resident_kernel,
            out_shape=jax.ShapeDtypeStruct((Bp, Ep), jnp.float32),
            grid_spec=pltpu.PrefetchScalarGridSpec(
                num_scalar_prefetch=0,
                grid=grid,
                in_specs=[
                    pl.BlockSpec((tile_b, Vp), lambda b: (b, 0)),  # x tile
                    pl.BlockSpec((Vp, Hp), lambda b: (0, 0)),      # W1
                    pl.BlockSpec((1, Hp), lambda b: (0, 0)),       # scale1
                    pl.BlockSpec((1, Hp), lambda b: (0, 0)),       # shift1
                    pl.BlockSpec((Hp, Ep), lambda b: (0, 0)),      # W2
                    pl.BlockSpec((1, Ep), lambda b: (0, 0)),       # scale2
                    pl.BlockSpec((1, Ep), lambda b: (0, 0)),       # shift2
                ],
                out_specs=pl.BlockSpec((tile_b, Ep), lambda b: (b, 0)),
            ),
            compiler_params=pltpu.CompilerParams(
                dimension_semantics=("parallel",),
                vmem_limit_bytes=_vmem_limit(vmem_est),
            ),
            cost_estimate=cost,
        )(xp, w1p, s1p, t1p, w2p, s2p, t2p)
    else:
        # --- Streamed path: tile the vocab reduction with large K tiles. ---- #
        tile_v = 128
        for cand in (1024, 512, 256):
            if Vp % cand == 0 and 2 * cand * Hp * 2 <= 16 * 2 ** 20:
                tile_v = cand
                break
        grid = (Bp // tile_b, Vp // tile_v)
        vmem_est = (2 * (tile_b * tile_v * 2 + tile_v * Hp * 2)  # x / W1 tiles
                    + 2 * (Hp * Ep * 2 + tile_b * Ep * 4)        # W2 / out
                    + 8 * (Hp + Ep)                              # scale/shift
                    + tile_b * Hp * 4)                           # acc scratch
        out_padded = pl.pallas_call(
            _tag_encoder_streamed_kernel,
            out_shape=jax.ShapeDtypeStruct((Bp, Ep), jnp.float32),
            grid_spec=pltpu.PrefetchScalarGridSpec(
                num_scalar_prefetch=0,
                grid=grid,
                in_specs=[
                    pl.BlockSpec((tile_b, tile_v), lambda b, k: (b, k)),  # x
                    pl.BlockSpec((tile_v, Hp), lambda b, k: (k, 0)),      # W1
                    pl.BlockSpec((1, Hp), lambda b, k: (0, 0)),           # s1
                    pl.BlockSpec((1, Hp), lambda b, k: (0, 0)),           # t1
                    pl.BlockSpec((Hp, Ep), lambda b, k: (0, 0)),          # W2
                    pl.BlockSpec((1, Ep), lambda b, k: (0, 0)),           # s2
                    pl.BlockSpec((1, Ep), lambda b, k: (0, 0)),           # t2
                ],
                out_specs=pl.BlockSpec((tile_b, Ep), lambda b, k: (b, 0)),
                scratch_shapes=[pltpu.VMEM((tile_b, Hp), jnp.float32)],
            ),
            compiler_params=pltpu.CompilerParams(
                dimension_semantics=("parallel", "arbitrary"),
                vmem_limit_bytes=_vmem_limit(vmem_est),
            ),
            cost_estimate=cost,
        )(xp, w1p, s1p, t1p, w2p, s2p, t2p)

    return out_padded[:B, :Ed]


# --------------------------------------------------------------------------- #
# Pure-JAX reference (eval-mode TagEncoder forward)
# --------------------------------------------------------------------------- #
def tag_encoder_ref(x, w1, b1, g1, be1, m1, v1, w2, b2, g2, be2, m2, v2,
                    eps=1e-5):
    h = jnp.dot(x, w1, preferred_element_type=jnp.float32) + b1
    h = (h - m1) * jax.lax.rsqrt(v1 + eps) * g1 + be1
    h = jnp.maximum(h, 0.0)
    y = jnp.dot(h, w2, preferred_element_type=jnp.float32) + b2
    y = (y - m2) * jax.lax.rsqrt(v2 + eps) * g2 + be2
    return jnp.maximum(y, 0.0)


if __name__ == "__main__":
    # Small deterministic setup consistent with TagEncoder defaults
    # (vocab_size -> hidden_size=200 -> encoding_size=50), non-tile-aligned on
    # purpose to exercise the padding path.
    vocab_size = 300
    hidden_size = 200
    encoding_size = 50
    batch = 16

    key = jax.random.PRNGKey(0)
    keys = jax.random.split(key, 14)

    # nn.Linear default init: U(-1/sqrt(fan_in), 1/sqrt(fan_in))
    lim1 = 1.0 / (vocab_size ** 0.5)
    lim2 = 1.0 / (hidden_size ** 0.5)
    w1 = jax.random.uniform(keys[0], (vocab_size, hidden_size), jnp.float32,
                            -lim1, lim1)
    b1 = jax.random.uniform(keys[1], (hidden_size,), jnp.float32, -lim1, lim1)
    w2 = jax.random.uniform(keys[2], (hidden_size, encoding_size), jnp.float32,
                            -lim2, lim2)
    b2 = jax.random.uniform(keys[3], (encoding_size,), jnp.float32,
                            -lim2, lim2)

    # BatchNorm1d (eval mode): affine gamma/beta + running mean/var.
    g1 = 1.0 + 0.1 * jax.random.normal(keys[4], (hidden_size,), jnp.float32)
    be1 = 0.1 * jax.random.normal(keys[5], (hidden_size,), jnp.float32)
    m1 = 0.1 * jax.random.normal(keys[6], (hidden_size,), jnp.float32)
    v1 = jax.random.uniform(keys[7], (hidden_size,), jnp.float32, 0.5, 1.5)

    g2 = 1.0 + 0.1 * jax.random.normal(keys[8], (encoding_size,), jnp.float32)
    be2 = 0.1 * jax.random.normal(keys[9], (encoding_size,), jnp.float32)
    m2 = 0.1 * jax.random.normal(keys[10], (encoding_size,), jnp.float32)
    v2 = jax.random.uniform(keys[11], (encoding_size,), jnp.float32, 0.5, 1.5)

    x = jax.random.normal(keys[12], (batch, vocab_size), dtype=jnp.float32)

    # One-time parameter preparation (fold + pad + bf16 cast), then apply.
    params = prepare_tag_encoder_params(
        w1, b1, g1, be1, m1, v1, w2, b2, g2, be2, m2, v2)

    ref = tag_encoder_ref(x, w1, b1, g1, be1, m1, v1, w2, b2, g2, be2, m2, v2)

    # Default (resident, no-K-reduction) path.
    out = tag_encoder_apply(params, x)
    out = jax.block_until_ready(out)
    assert out.shape == (batch, encoding_size)
    assert jnp.allclose(out, ref, atol=2e-2, rtol=2e-2), \
        "resident path mismatch vs reference"

    # Also exercise the streamed K-reduction path (forced) for coverage.
    out_s = tag_encoder_apply(params, x, max_resident_w1_bytes=0)
    out_s = jax.block_until_ready(out_s)
    assert jnp.allclose(out_s, ref, atol=2e-2, rtol=2e-2), \
        "streamed path mismatch vs reference"

    print("KERNEL_OK")
</pallas_src>

<mosaic_0001>
module attributes {stable_mosaic.version = 11 : i64} {
  func.func @_tag_encoder_resident_kernel(%arg0: i32, %arg1: memref<8x384xbf16, #tpu.memory_space<vmem>>, %arg2: memref<384x256xbf16, #tpu.memory_space<vmem>>, %arg3: memref<1x256xf32, #tpu.memory_space<vmem>>, %arg4: memref<1x256xf32, #tpu.memory_space<vmem>>, %arg5: memref<256x128xbf16, #tpu.memory_space<vmem>>, %arg6: memref<1x128xf32, #tpu.memory_space<vmem>>, %arg7: memref<1x128xf32, #tpu.memory_space<vmem>>, %arg8: memref<8x128xf32, #tpu.memory_space<vmem>>) attributes {dimension_semantics = [#tpu.dimension_semantics<parallel>], iteration_bounds = array<i64: 2>, scalar_prefetch = 0 : i64, scratch_operands = 0 : i64, tpu.core_type = #tpu.core_type<tc>, window_params = [{transform_indices = @transform_0, window_bounds = array<i64: 8, 384>}, {pipeline_mode = #tpu.pipeline_mode<synchronous>, transform_indices = @transform_1, window_bounds = array<i64: 384, 256>}, {pipeline_mode = #tpu.pipeline_mode<synchronous>, transform_indices = @transform_2, window_bounds = array<i64: 1, 256>}, {pipeline_mode = #tpu.pipeline_mode<synchronous>, transform_indices = @transform_3, window_bounds = array<i64: 1, 256>}, {pipeline_mode = #tpu.pipeline_mode<synchronous>, transform_indices = @transform_4, window_bounds = array<i64: 256, 128>}, {pipeline_mode = #tpu.pipeline_mode<synchronous>, transform_indices = @transform_5, window_bounds = array<i64: 1, 128>}, {pipeline_mode = #tpu.pipeline_mode<synchronous>, transform_indices = @transform_6, window_bounds = array<i64: 1, 128>}, {transform_indices = @transform_7, window_bounds = array<i64: 8, 128>}]} {
    %c0 = arith.constant 0 : index
    %c0_0 = arith.constant 0 : index
    %0 = vector.load %arg1[%c0, %c0_0] : memref<8x384xbf16, #tpu.memory_space<vmem>>, vector<8x384xbf16>
    %c0_1 = arith.constant 0 : index
    %c0_2 = arith.constant 0 : index
    %1 = vector.load %arg2[%c0_1, %c0_2] : memref<384x256xbf16, #tpu.memory_space<vmem>>, vector<384x256xbf16>
    %cst = arith.constant dense<0.000000e+00> : vector<8x256xf32>
    %2 = tpu.matmul %0, %1, %cst {dimension_numbers = #tpu.dot_dimension_numbers<[1], [0], [0], [1], [0, 0, 1, 1], [], []>} : vector<8x384xbf16>, vector<384x256xbf16>, vector<8x256xf32> -> vector<8x256xf32>
    %c0_3 = arith.constant 0 : index
    %c0_4 = arith.constant 0 : index
    %3 = vector.load %arg3[%c0_3, %c0_4] : memref<1x256xf32, #tpu.memory_space<vmem>>, vector<1x256xf32>
    %4 = vector.broadcast %3 : vector<1x256xf32> to vector<8x256xf32>
    %5 = arith.mulf %2, %4 : vector<8x256xf32>
    %c0_5 = arith.constant 0 : index
    %c0_6 = arith.constant 0 : index
    %6 = vector.load %arg4[%c0_5, %c0_6] : memref<1x256xf32, #tpu.memory_space<vmem>>, vector<1x256xf32>
    %7 = vector.broadcast %6 : vector<1x256xf32> to vector<8x256xf32>
    %8 = arith.addf %5, %7 : vector<8x256xf32>
    %cst_7 = arith.constant 0.000000e+00 : f32
    %9 = vector.broadcast %cst_7 : f32 to vector<8x256xf32>
    %10 = arith.maximumf %8, %9 : vector<8x256xf32>
    %11 = arith.truncf %10 : vector<8x256xf32> to vector<8x256xbf16>
    %c0_8 = arith.constant 0 : index
    %c0_9 = arith.constant 0 : index
    %12 = vector.load %arg5[%c0_8, %c0_9] : memref<256x128xbf16, #tpu.memory_space<vmem>>, vector<256x128xbf16>
    %cst_10 = arith.constant dense<0.000000e+00> : vector<8x128xf32>
    %13 = tpu.matmul %11, %12, %cst_10 {dimension_numbers = #tpu.dot_dimension_numbers<[1], [0], [0], [1], [0, 0, 1, 1], [], []>} : vector<8x256xbf16>, vector<256x128xbf16>, vector<8x128xf32> -> vector<8x128xf32>
    %c0_11 = arith.constant 0 : index
    %c0_12 = arith.constant 0 : index
    %14 = vector.load %arg6[%c0_11, %c0_12] : memref<1x128xf32, #tpu.memory_space<vmem>>, vector<1x128xf32>
    %15 = vector.broadcast %14 : vector<1x128xf32> to vector<8x128xf32>
    %16 = arith.mulf %13, %15 : vector<8x128xf32>
    %c0_13 = arith.constant 0 : index
    %c0_14 = arith.constant 0 : index
    %17 = vector.load %arg7[%c0_13, %c0_14] : memref<1x128xf32, #tpu.memory_space<vmem>>, vector<1x128xf32>
    %18 = vector.broadcast %17 : vector<1x128xf32> to vector<8x128xf32>
    %19 = arith.addf %16, %18 : vector<8x128xf32>
    %cst_15 = arith.constant 0.000000e+00 : f32
    %20 = vector.broadcast %cst_15 : f32 to vector<8x128xf32>
    %21 = arith.maximumf %19, %20 : vector<8x128xf32>
    %c0_16 = arith.constant 0 : index
    %c0_17 = arith.constant 0 : index
    %22 = vector.load %arg8[%c0_16, %c0_17] : memref<8x128xf32, #tpu.memory_space<vmem>>, vector<8x128xf32>
    tpu.vector_store %arg8[%c0_16, %c0_17], %21 {strides = array<i32>} : memref<8x128xf32, #tpu.memory_space<vmem>>, vector<8x128xf32>,
    return
  }
  func.func @transform_0(%arg0: i32) -> (i32, i32) {
    %c0_i32 = arith.constant 0 : i32
    %c0_i32_0 = arith.constant 0 : i32
    return %arg0, %c0_i32 : i32, i32
  }
  func.func @transform_1(%arg0: i32) -> (i32, i32) {
    %c0_i32 = arith.constant 0 : i32
    %c0_i32_0 = arith.constant 0 : i32
    %c0_i32_1 = arith.constant 0 : i32
    return %c0_i32, %c0_i32_0 : i32, i32
  }
  func.func @transform_2(%arg0: i32) -> (i32, i32) {
    %c0_i32 = arith.constant 0 : i32
    %c0_i32_0 = arith.constant 0 : i32
    %c0_i32_1 = arith.constant 0 : i32
    return %c0_i32, %c0_i32_0 : i32, i32
  }
  func.func @transform_3(%arg0: i32) -> (i32, i32) {
    %c0_i32 = arith.constant 0 : i32
    %c0_i32_0 = arith.constant 0 : i32
    %c0_i32_1 = arith.constant 0 : i32
    return %c0_i32, %c0_i32_0 : i32, i32
  }
  func.func @transform_4(%arg0: i32) -> (i32, i32) {
    %c0_i32 = arith.constant 0 : i32
    %c0_i32_0 = arith.constant 0 : i32
    %c0_i32_1 = arith.constant 0 : i32
    return %c0_i32, %c0_i32_0 : i32, i32
  }
  func.func @transform_5(%arg0: i32) -> (i32, i32) {
    %c0_i32 = arith.constant 0 : i32
    %c0_i32_0 = arith.constant 0 : i32
    %c0_i32_1 = arith.constant 0 : i32
    return %c0_i32, %c0_i32_0 : i32, i32
  }
  func.func @transform_6(%arg0: i32) -> (i32, i32) {
    %c0_i32 = arith.constant 0 : i32
    %c0_i32_0 = arith.constant 0 : i32
    %c0_i32_1 = arith.constant 0 : i32
    return %c0_i32, %c0_i32_0 : i32, i32
  }
  func.func @transform_7(%arg0: i32) -> (i32, i32) {
    %c0_i32 = arith.constant 0 : i32
    %c0_i32_0 = arith.constant 0 : i32
    return %arg0, %c0_i32 : i32, i32
  }
}

</mosaic_0001>

<bundles_post_ra>
// kernel: tpu_custom_call.1
= control target key start
LH: loop header
LB: loop body
LE: loop exit
PB: predicated region body
PF: predicated region fallthrough
CT: control target
= control target key end

     0   :  { %s1755_s0 = inlined_call_operand.hbm [shape: bf16[16,384], index: 0, kind: input, shape index: {}]   ;;  %s1756_s1 = inlined_call_operand.hbm [shape: bf16[384,256], index: 1, kind: input, shape index: {}]   ;;  %s1757_s2 = inlined_call_operand.vmem [shape: f32[1,256], index: 2, kind: input, shape index: {}]   ;;  %s1758_s3 = inlined_call_operand.vmem [shape: f32[1,256], index: 3, kind: input, shape index: {}]   ;;  %s1759_s4 = inlined_call_operand.hbm [shape: bf16[256,128], index: 4, kind: input, shape index: {}]   ;;  %s1760_s5 = inlined_call_operand.vmem [shape: f32[1,128], index: 5, kind: input, shape index: {}]   ;;  %s1761_s6 = inlined_call_operand.vmem [shape: f32[1,128], index: 6, kind: input, shape index: {}]   ;;  %s1762_s7 = inlined_call_operand.hbm [shape: f32[16,128], index: 7, kind: output, shape index: {}]  }
   0x1   :  { %1766 = sst [smem:[#allocation12_spill]] %s1756_s1 }
   0x2   :  { %12 = vsyncpa [#allocation3], 0 }
   0x3   :  { %14 = vsyncpa [#allocation3 + $0x1], 0 }
   0x4   :  { %15 = vsyncpa [#allocation6], 0 }
   0x5   :  { %16 = vsyncpa [#allocation4], 0 }
   0x6   :  { %18 = vsyncpa [#allocation4 + $0x1], 0  ;;  %s1509_s24 = smov 0   ;;  %s1511_s25 = smov 0  }
   0x7   :  { %s1513_s26 = smov 0   ;;  %s1515_s27 = smov 0  }
   0x8 LB: > { %s1530_s28 = sadd.s32 4294967295, %s1458_s27   ;;  %s1029_s29 = sadd.s32 4294967294, %s1458_s27   ;;  %s1458_s27 = sphi %s1515_s27, %s1784_s27   ;;  %s1454_s26 = sphi %s1513_s26, %s1783_s26   ;;  %s1450_s25 = sphi %s1511_s25, %s1782_s25   ;;  %s1446_s24 = sphi %s1509_s24, %s1781_s24  }
   0x9   : > { %p44_p0 = scmp.ne.s32.totalorder %s1450_s25, %s1446_s24  ;;  %p1763_p1 = scmp.eq.s32.totalorder %s1530_s28, 0 }
   0xa   : > { %p200_p3 = scmp.eq.s32.totalorder %s1029_s29, 1  ;;  %p1030_p5 = scmp.ge.s32.totalorder %s1458_s27, 1 }
   0xb   : > { %p1539_p4 = por %p1763_p1, %p44_p0  ;;  %p207_p7 = scmp.lt.s32.totalorder %s1458_s27, 3 }
   0xc   : > { %p1544_p6 = por %p200_p3, %p44_p0  ;;  %s1460_s10 = smov [#allocation5]  }
   0xd   : > { %s1767_s30 = scalar_select %p1539_p4, 1, 0 }
   0xe   : > { %s1768_s8 = scalar_select %p1544_p6, 1, 0 }
   0xf   : > { %p1549_p8 = pnand %p1030_p5, %p207_p7  ;;  %s219_s11 = sshll.u32 %s1460_s10, 4  ;;  %s1553_s11 = int_to_ptr.vmem [resolvable:$true] %s219_s11 }
  0x10   : > { %s1461_s13 = smov [#allocation7]   ;;  %s1771_s1 = sld [smem:[#allocation12_spill]] }
  0x11   : > { %p1151_p9 = pneg %p1549_p8  ;;  %s238_s14 = sshll.u32 %s1461_s13, 4  ;;  %s1564_s14 = int_to_ptr.vmem [resolvable:$true] %s238_s14 }
  0x13   : > { %p1560_p11 = pnand %p1151_p9, %p1763_p1 }
  0x15   : > { %p1304_p13 = pneg %p1560_p11 }
  0x16   : > { %s1302_s17 = scalar_lea.hbm %s1771_s1, 6144 }
  0x17   : > { %p1303_p12 = scmp.ne.s32.totalorder %s1771_s1, %s1302_s17  ;;  %p1309_p5 = scmp.lt.u32.totalorder %s1302_s17, %s1771_s1 }
  0x19   : > { %p1305_p0 = pnand %p1304_p13, %p1303_p12 }
  0x1b   : > { %p1306_p3 = pneg %p1305_p0 }
  0x1d   : > { %p1311_p7 = pnand %p1309_p5, %p1306_p3 }
  0x1f   : > { %1314 = shalt.err (!%p1311_p7)
}
  0x20   : > { %s1315_s22 = scalar_lea.vmem %s1553_s11, 6144  ;;  %p1323_p2 = scmp.lt.s32.totalorder %s1553_s11, %s1553_s11 }
  0x21   : > { %p1316_p9 = scmp.ne.s32.totalorder %s1553_s11, %s1315_s22  ;;  %p1324_p12 = scmp.lt.s32.totalorder %s1315_s22, %s1315_s22 }
  0x23   : > { %p1318_p10 = pnand %p1316_p9, %p1304_p13  ;;  %p1325_p0 = por %p1324_p12, %p1323_p2 }
  0x25   : > { %p1319_p1 = pneg %p1318_p10 }
  0x27   : > { %p1326_p6 = pnand %p1325_p0, %p1319_p1 }
  0x29   : > { %1329 = shalt.err (!%p1326_p6)
}
  0x2a   : > { %s1462_s23 = smov 128   ;;  %s1463_s29 = smov 8  }
  0x2b   : > { %1154 = dma.hbm_to_vmem [thread:$0]  (!%p1560_p11), %s1771_s1, 6144, %s1553_s11, [#allocation6], %s1462_s23, %s1462_s23, %s1463_s29  }
  0x2c   : > { %s1330_s17 = scalar_lea.hbm %s1759_s4, 2048 }
  0x2d   : > { %p1331_p2 = scmp.ne.s32.totalorder %s1759_s4, %s1330_s17  ;;  %p1337_p10 = scmp.lt.u32.totalorder %s1330_s17, %s1759_s4 }
  0x2f   : > { %p1333_p1 = pnand %p1331_p2, %p1304_p13 }
  0x31   : > { %p1334_p6 = pneg %p1333_p1 }
  0x33   : > { %p1339_p3 = pnand %p1337_p10, %p1334_p6 }
  0x35   : > { %1342 = shalt.err (!%p1339_p3)
}
  0x36   : > { %s1343_s11 = scalar_lea.vmem %s1564_s14, 2048  ;;  %p1351_p12 = scmp.lt.s32.totalorder %s1564_s14, %s1564_s14 }
  0x37   : > { %p1344_p5 = scmp.ne.s32.totalorder %s1564_s14, %s1343_s11  ;;  %p1352_p0 = scmp.lt.s32.totalorder %s1343_s11, %s1343_s11 }
  0x39   : > { %p1346_p7 = pnand %p1344_p5, %p1304_p13  ;;  %p1353_p2 = por %p1352_p0, %p1351_p12 }
  0x3b   : > { %p1347_p9 = pneg %p1346_p7 }
  0x3d   : > { %p1354_p1 = pnand %p1353_p2, %p1347_p9 }
  0x3f   : > { %1357 = shalt.err (!%p1354_p1)
}
  0x40   : > { %s1464_s22 = smov 64   ;;  %s1465_s23 = smov 4  }
  0x41   : > { %1157 = dma.hbm_to_vmem [thread:$0]  (!%p1560_p11), %s1759_s4, 2048, %s1564_s14, [#allocation6], %s1464_s22, %s1464_s22, %s1465_s23  }
  0x42   : > { %s1619_s13 = sadd.s32 1, %s1458_s27   ;;  %s31_s16 = sadd.s32 1, %s1454_s26 }
  0x43   : > { %s28_s15 = ssub.s32 %s1458_s27, %s1619_s13  ;;  %p38_p6 = scmp.ne.s32.totalorder %s1454_s26, %s1450_s25 }
  0x44   : > { %p29_p13 = scmp.eq.s32.totalorder %s28_s15, 0  ;;  %p39_p10 = scmp.eq.s32.totalorder %s1458_s27, 0 }
  0x45   : > { %p1772_p5 = scmp.eq.s32.totalorder %s1530_s28, 1  ;;  %p1168_p9 = scmp.lt.s32.totalorder %s1458_s27, 2 }
  0x46   : > { %s1628_s17 = scalar_select %p29_p13, %s1454_s26, %s31_s16  }
  0x47   : > { %p40_p3 = por %p39_p10, %p38_p6  ;;  %p1632_p7 = por %p1772_p5, %p38_p6 }
  0x48   : > { %s258_s12 = sand.u32 1, %s1454_s26   ;;  %s1137_s14 = smul.u32 192, %s1458_s27 }
  0x49   : > { %s1773_s18 = scalar_select %p1632_p7, 1, 0 }
  0x4a   : > { %s1136_s19 = smul.u32 12, %s258_s12  ;;  %p1639_p11 = pnand %p1168_p9, %p40_p3 }
  0x4b   : > { %s1646_s22 = scalar_lea.hbm %s1755_s0, %s1137_s14  ;;  %s259_s10 = scalar_lea.sflag [#allocation3], %s258_s12 }
  0x4c   : > { %s262_s23 = scalar_lea.vmem [#allocation2], %s1136_s19  ;;  %s1358_s15 = scalar_lea.hbm %s1646_s22, 192 }
  0x4d   : > { %s270_s29 = sshll.u32 %s262_s23, 4  ;;  %p1359_p12 = scmp.ne.s32.totalorder %s1646_s22, %s1358_s15  ;;  %s1648_s29 = int_to_ptr.vmem [resolvable:$true] %s270_s29 }
  0x4e   : > { %p1360_p0 = pneg %p1639_p11  ;;  %s1363_s21 = scalar_lea.hbm %s1755_s0, 384 }
  0x4f   : > { %p1364_p13 = scmp.lt.u32.totalorder %s1646_s22, %s1755_s0  ;;  %p1365_p6 = scmp.lt.u32.totalorder %s1363_s21, %s1358_s15 }
  0x50   : > { %p1361_p2 = pnand %p1360_p0, %p1359_p12  ;;  %p1367_p3 = scmp.lt.u32.totalorder %s1358_s15, %s1646_s22 }
  0x51   : > { %p1366_p10 = por %p1365_p6, %p1364_p13 }
  0x52   : > { %p1362_p1 = pneg %p1361_p2 }
  0x53   : > { %p1368_p5 = por %p1367_p3, %p1366_p10 }
  0x55   : > { %p1369_p9 = pnand %p1368_p5, %p1362_p1 }
  0x57   : > { %1372 = shalt.err (!%p1369_p9)
}
  0x58   : > { %s1373_s12 = scalar_lea.vmem %s1648_s29, 192  ;;  %s1466_s19 = smov [#allocation2]  }
  0x59   : > { %p1374_p12 = scmp.ne.s32.totalorder %s1648_s29, %s1373_s12  ;;  %s1378_s23 = sshll.u32 %s1466_s19, 4  ;;  %s1379_s23 = int_to_ptr.vmem [resolvable:$false] %s1378_s23 }
  0x5a   : > { %s1380_s1 = scalar_lea.vmem %s1379_s23, 384  ;;  %p1381_p4 = scmp.lt.s32.totalorder %s1648_s29, %s1379_s23 }
  0x5b   : > { %p1376_p2 = pnand %p1374_p12, %p1360_p0  ;;  %p1382_p13 = scmp.lt.s32.totalorder %s1380_s1, %s1373_s12 }
  0x5d   : > { %p1377_p7 = pneg %p1376_p2  ;;  %p1383_p6 = por %p1382_p13, %p1381_p4 }
  0x5f   : > { %p1384_p10 = pnand %p1383_p6, %p1377_p7 }
  0x61   : > { %1387 = shalt.err (!%p1384_p10)
}
  0x62   : > { %1161 = dma.hbm_to_vmem [thread:$0]  (!%p1639_p11), %s1646_s22, 192, %s1648_s29, %s259_s10  }
  0x63   : > { %279 = sbr.rel (%p1549_p8) target bundleno = 634 (0x27a), region = 48  ;;  %s1678_s15 = sand.u32 (!%p1549_p8), 1, %s1450_s25  }
  0x64   : > { %s1138_s16 = smul.u32 (!%p1549_p8), 12, %s1678_s15  ;;  %s282_s14 = scalar_lea.sflag (!%p1549_p8), [#allocation3], %s1678_s15 }
  0x65   : > { %p1775_p4 = scmp.ne.s32.totalorder (!%p1549_p8), %s1767_s30, 0 }
  0x66   : > { %s1682_s21 = scalar_lea.vmem (!%p1549_p8), [#allocation2], %s1138_s16 }
  0x6a   : > { %1433 = dma.done.wait (%p1775_p4), %s282_s14, 192  }
  0x6b   : > { %1435 = vsyncadd (%p1775_p4), %s282_s14, 4294967104  ;;  %p1776_p7 = scmp.eq.s32.totalorder %s1530_s28, 0 }
  0x6d   : > { %1437 = dma.done.wait (%p1776_p7), [#allocation6], 8192   ;;  %p1777_p8 = pmov %p1776_p7 }
  0x6e   : > { %v1467_v0 = vmov 0   ;;  %v1211_v1 = vld [vmem:[#allocation5 + $0x4] ss:$8 sps:$4 sm:$0xff]   ;;  %v1213_v2 = vld [vmem:[#allocation5] ss:$8 sps:$4 sm:$0xff]   ;;  %v1290_v50 = vld [vmem:[#allocation7 + $0x50] sm:$0xff]  }
  0x6f   : > { %1439 = vsyncadd (%p1777_p8), [#allocation6], 4294959104  ;;  %699 = vmatprep.mubr.bf16.mxu1 %v1467_v0  ;;  %626 = vmatprep.subr.bf16.mxu0 %v1211_v1  ;;  %v1214_v3 = vld [vmem:[#allocation5 + $0x14] ss:$8 sps:$4 sm:$0xff]   ;;  %v1216_v4 = vld [vmem:[#allocation5 + $0x10] ss:$8 sps:$4 sm:$0xff]  }
  0x70   : > { %627 = vmatpush1.bf16.msra.mxu0 %v1213_v2  ;;  %v1217_v5 = vld [vmem:[#allocation5 + $0x24] ss:$8 sps:$4 sm:$0xff]   ;;  %v1219_v6 = vld [vmem:[#allocation5 + $0x20] ss:$8 sps:$4 sm:$0xff]   ;;  %v1220_v7 = vld [vmem:[#allocation5 + $0x34] ss:$8 sps:$4 sm:$0xff]  }
  0x71   : > { %628 = vmatprep.subr.bf16.mxu0 %v1214_v3  ;;  %v1222_v8 = vld [vmem:[#allocation5 + $0x30] ss:$8 sps:$4 sm:$0xff]   ;;  %v1235_v9 = vld [vmem:[#allocation5 + $0x104] ss:$8 sps:$4 sm:$0xff]   ;;  %v1237_v10 = vld [vmem:[#allocation5 + $0x100] ss:$8 sps:$4 sm:$0xff]  }
  0x72   : > { %v1223_v11 = vld [vmem:[#allocation5 + $0x44] ss:$8 sps:$4 sm:$0xff]   ;;  %667 = vmatprep.subr.bf16.mxu1 %v1235_v9  ;;  %v1241_v12 = vld [vmem:[#allocation5 + $0x114] ss:$8 sps:$4 sm:$0xff]   ;;  %v1243_v13 = vld [vmem:[#allocation5 + $0x110] ss:$8 sps:$4 sm:$0xff]   ;;  %v710_v9 = vlaneseq }
  0x73   : > { %668 = vmatpush1.bf16.msra.mxu1 %v1237_v10  ;;  %v1225_v14 = vld [vmem:[#allocation5 + $0x40] ss:$8 sps:$4 sm:$0xff]   ;;  %v1226_v15 = vld [vmem:[#allocation5 + $0x54] ss:$8 sps:$4 sm:$0xff]   ;;  %v1247_v16 = vld [vmem:[#allocation5 + $0x124] ss:$8 sps:$4 sm:$0xff]  }
  0x74   : > { %629 = vmatpush1.bf16.msra.mxu0 %v1216_v4  ;;  %669 = vmatprep.subr.bf16.mxu1 %v1241_v12  ;;  %v1249_v17 = vld [vmem:[#allocation5 + $0x120] ss:$8 sps:$4 sm:$0xff]   ;;  %v1228_v18 = vld [vmem:[#allocation5 + $0x50] ss:$8 sps:$4 sm:$0xff]   ;;  %v1253_v19 = vld [vmem:[#allocation5 + $0x134] ss:$8 sps:$4 sm:$0xff]  }
  0x75   : > { %630 = vmatprep.subr.bf16.mxu0 %v1217_v5  ;;  %v1229_v20 = vld [vmem:[#allocation5 + $0x64] ss:$8 sps:$4 sm:$0xff]   ;;  %v1255_v21 = vld [vmem:[#allocation5 + $0x130] ss:$8 sps:$4 sm:$0xff]   ;;  %v1231_v22 = vld [vmem:[#allocation5 + $0x60] ss:$8 sps:$4 sm:$0xff]  }
  0x76   : > { %v1259_v23 = vld [vmem:[#allocation5 + $0x144] ss:$8 sps:$4 sm:$0xff]   ;;  %v1232_v24 = vld [vmem:[#allocation5 + $0x74] ss:$8 sps:$4 sm:$0xff]   ;;  %v1261_v25 = vld [vmem:[#allocation5 + $0x140] ss:$8 sps:$4 sm:$0xff]  }
  0x77   : > { %670 = vmatpush1.bf16.msra.mxu1 %v1243_v13  ;;  %v1234_v26 = vld [vmem:[#allocation5 + $0x70] ss:$8 sps:$4 sm:$0xff]   ;;  %v1265_v27 = vld [vmem:[#allocation5 + $0x154] ss:$8 sps:$4 sm:$0xff]   ;;  %v1238_v28 = vld [vmem:[#allocation5 + $0x84] ss:$8 sps:$4 sm:$0xff]  }
  0x78   : > { %631 = vmatpush1.bf16.msra.mxu0 %v1219_v6  ;;  %671 = vmatprep.subr.bf16.mxu1 %v1247_v16  ;;  %v1267_v29 = vld [vmem:[#allocation5 + $0x150] ss:$8 sps:$4 sm:$0xff]   ;;  %v1240_v30 = vld [vmem:[#allocation5 + $0x80] ss:$8 sps:$4 sm:$0xff]   ;;  %v1271_v31 = vld [vmem:[#allocation5 + $0x164] ss:$8 sps:$4 sm:$0xff]  }
  0x79   : > { %632 = vmatprep.subr.bf16.mxu0 %v1220_v7  ;;  %v1244_v32 = vld [vmem:[#allocation5 + $0x94] ss:$8 sps:$4 sm:$0xff]   ;;  %v1246_v34 = vld [vmem:[#allocation5 + $0x90] ss:$8 sps:$4 sm:$0xff]   ;;  %v1273_v36 = vld [vmem:[#allocation5 + $0x160] ss:$8 sps:$4 sm:$0xff]  }
  0x7a   : > { %v325_v33 = vld [vmem:[%s1682_s21] sm:$0xff]  ;;  %v1283_v42 = vld [vmem:[%s1682_s21 + $0x8] ss:$0 sps:$4 sm:$0xff]   ;;  %v1286_v43 = vld [vmem:[#allocation7 + $0x40] sm:$0xff]   ;;  %v711_v10 = vshrl.u32 %v710_v9, 7  ;;  %s1038_s29 = sshll.u32 %s1678_s15, 3 }
  0x7b   : > { %672 = vmatpush1.bf16.msra.mxu1 %v1249_v17  ;;  %v1040_v35 = vcombine.high %v325_v33, %v325_v33  ;;  %v1277_v37 = vld [vmem:[#allocation5 + $0x174] ss:$8 sps:$4 sm:$0xff]   ;;  %v1250_v38 = vld [vmem:[#allocation5 + $0xa4] ss:$8 sps:$4 sm:$0xff]   ;;  %v1252_v39 = vld [vmem:[#allocation5 + $0xa0] ss:$8 sps:$4 sm:$0xff]   ;;  %v1039_v60 = vcombine.low %v325_v33, %v325_v33 }
  0x7c   : > { %633 = vmatpush1.bf16.msra.mxu0 %v1222_v8  ;;  %673 = vmatprep.subr.bf16.mxu1 %v1253_v19  ;;  %v1256_v40 = vld [vmem:[#allocation5 + $0xb4] ss:$8 sps:$4 sm:$0xff]   ;;  %v1279_v41 = vld [vmem:[#allocation5 + $0x170] ss:$8 sps:$4 sm:$0xff]   ;;  %v1287_v44 = vld [vmem:[#allocation7] sm:$0xff]   ;;  %v716_v13 = vsub.s32 1, %v711_v10 }
  0x7d   : > { %634 = vmatprep.subr.bf16.mxu0 %v1223_v11  ;;  %658 = vmatprep.mubr.bf16.mxu0 %v1040_v35  ;;  %v1258_v45 = vld [vmem:[#allocation5 + $0xb0] ss:$8 sps:$4 sm:$0xff]   ;;  %v1288_v46 = vld [vmem:[#allocation7 + $0x48] sm:$0xff]   ;;  %v1268_v51 = vld [vmem:[#allocation5 + $0xd4] ss:$8 sps:$4 sm:$0xff]   ;;  %v712_v11 = vsub.s32 0, %v711_v10 }
  0x7e   : > { %v1262_v47 = vld [vmem:[#allocation5 + $0xc4] ss:$8 sps:$4 sm:$0xff]   ;;  %v1264_v49 = vld [vmem:[#allocation5 + $0xc0] ss:$8 sps:$4 sm:$0xff]   ;;  %v1291_v52 = vld [vmem:[#allocation7 + $0x10] sm:$0xff]   ;;  %s1109_s23 = sshll.u32 %s1530_s28, 7 }
  0x7f   : > { %674 = vmatpush1.bf16.msra.mxu1 %v1255_v21  ;;  %v1289_v48 = vld [vmem:[#allocation7 + $0x8] sm:$0xff]   ;;  %v1270_v53 = vld [vmem:[#allocation5 + $0xd0] ss:$8 sps:$4 sm:$0xff]   ;;  %v1280_v58 = vld [vmem:[#allocation5 + $0xf4] ss:$8 sps:$4 sm:$0xff]   ;;  %s323_s1 = scalar_lea.vmem [#allocation8], %s1038_s29  ;;  %s1711_s30 = scalar_lea.hbm %s1762_s7, %s1109_s23 }
  0x80   : > { %635 = vmatpush1.bf16.msra.mxu0 %v1225_v14  ;;  %675 = vmatprep.subr.bf16.mxu1 %v1259_v23  ;;  %v1292_v54 = vld [vmem:[#allocation7 + $0x58] sm:$0xff]   ;;  %v1274_v55 = vld [vmem:[#allocation5 + $0xe4] ss:$8 sps:$4 sm:$0xff]   ;;  %v1276_v57 = vld [vmem:[#allocation5 + $0xe0] ss:$8 sps:$4 sm:$0xff]   ;;  %s940_s16 = sshll.u32 %s323_s1, 4  ;;  %s1713_s16 = int_to_ptr.vmem [resolvable:$true] %s940_s16 }
  0x81   : > { %636 = vmatprep.subr.bf16.mxu0 %v1226_v15  ;;  %v1293_v56 = vld [vmem:[#allocation7 + $0x18] sm:$0xff]   ;;  %v1294_v61 = vld [vmem:[#allocation7 + $0x60] sm:$0xff]   ;;  %v1296_v63 = vld [vmem:[#allocation7 + $0x68] sm:$0xff]   ;;  %s927_s9 = scalar_lea.sflag [#allocation4], %s1678_s15  ;;  %s1388_s20 = scalar_lea.vmem %s1713_s16, 128 }
  0x82   : > { %v1282_v59 = vld [vmem:[#allocation5 + $0xf0] ss:$8 sps:$4 sm:$0xff]   ;;  %v1295_v62 = vld [vmem:[#allocation7 + $0x20] sm:$0xff]   ;;  %v1297_v0 = vld [vmem:[#allocation7 + $0x28] sm:$0xff]   ;;  %p1389_p11 = scmp.ne.s32.totalorder %s1713_s16, %s1388_s20  ;;  %p1778_p0 = scmp.ne.s32.totalorder %s1773_s18, 0 }
  0x83   : > { %676 = vmatpush1.bf16.msra.mxu1 %v1261_v25  ;;  %v1298_v1 = vld [vmem:[#allocation7 + $0x70] sm:$0xff]   ;;  %v1300_v3 = vld [vmem:[#allocation7 + $0x78] sm:$0xff]   ;;  %v708_v12 = vld [vmem:[%s1757_s2] sm:$0x3]  ;;  %s1468_s28 = smov [#allocation8]  }
  0x84   : > { %637 = vmatpush1.bf16.msra.mxu0 %v1228_v18  ;;  %677 = vmatprep.subr.bf16.mxu1 %v1265_v27  ;;  %v1299_v2 = vld [vmem:[#allocation7 + $0x30] sm:$0xff]   ;;  %v1301_v4 = vld [vmem:[#allocation7 + $0x38] sm:$0xff]   ;;  %v722_v14 = vld [vmem:[%s1758_s3] sm:$0x3]  ;;  %v713_v15 = vrot.slane %v708_v12, %v712_v11  ;;  %v717_v17 = vrot.slane %v708_v12, %v716_v13  ;;  %p1390_p1 = pnand %p1389_p11, %p1778_p0  ;;  %s1392_s22 = sshll.u32 %s1468_s28, 4  ;;  %s1393_s22 = int_to_ptr.vmem [resolvable:$false] %s1392_s22 }
  0x85   : > { %638 = vmatprep.subr.bf16.mxu0 %v1229_v20  ;;  %v727_v19 = vrot.slane %v722_v14, %v712_v11  ;;  %v1106_v35 = vld [vmem:[%s1760_s5] ss:$0 sm:$0xff]  ;;  %s1394_s29 = scalar_lea.vmem %s1393_s22, 256  ;;  %p1395_p5 = scmp.lt.s32.totalorder %s1713_s16, %s1393_s22 }
  0x86   : > { %p1391_p3 = pneg %p1390_p1  ;;  %p1396_p9 = scmp.lt.s32.totalorder %s1394_s29, %s1388_s20 }
  0x87   : > { %678 = vmatpush1.bf16.msra.mxu1 %v1267_v29 }
  0x88   : > { %639 = vmatpush1.bf16.msra.mxu0 %v1231_v22  ;;  %679 = vmatprep.subr.bf16.mxu1 %v1271_v31  ;;  %v731_v22 = vrot.slane %v722_v14, %v716_v13  ;;  %p1397_p12 = por %p1396_p9, %p1395_p5 }
  0x89   : > { %640 = vmatprep.subr.bf16.mxu0 %v1232_v24 }
  0x8a   : > { %p1398_p2 = pnand %p1397_p12, %p1391_p3 }
  0x8b   : > { %680 = vmatpush1.bf16.msra.mxu1 %v1273_v36 }
  0x8c   : > { %641 = vmatpush1.bf16.msra.mxu0 %v1234_v26  ;;  %681 = vmatprep.subr.bf16.mxu1 %v1277_v37 }
  0x8d   : > { %642 = vmatprep.subr.bf16.mxu0 %v1238_v28 }
  0x8f   : > { %682 = vmatpush1.bf16.msra.mxu1 %v1279_v41 }
  0x90   : > { %643 = vmatpush1.bf16.msra.mxu0 %v1240_v30  ;;  %1112 = vmatprep.subr.bf16.mxu1 %v1286_v43 }
  0x91   : > { %644 = vmatprep.subr.bf16.mxu0 %v1244_v32 }
  0x92   : > { %700 = vmatmul.mubr.bf16.vlgmr.msra.gmra.mrb[0].mxu1 %v1283_v42 }
  0x93   : > { %1113 = vmatpush3.bf16.msra.mxu1 %v1287_v44 }
  0x94   : > { %645 = vmatpush1.bf16.msra.mxu0 %v1246_v34  ;;  %1114 = vmatprep.subr.bf16.mxu1 %v1288_v46 }
  0x95   : > { %646 = vmatprep.subr.bf16.mxu0 %v1250_v38  ;;  %v1107_v38 = vld [vmem:[%s1761_s6] ss:$0 sm:$0xff] }
  0x97   : > { %1115 = vmatpush3.bf16.msra.mxu1 %v1289_v48 }
  0x98   : > { %647 = vmatpush1.bf16.msra.mxu0 %v1252_v39  ;;  %1116 = vmatprep.subr.bf16.mxu1 %v1290_v50 }
  0x99   : > { %648 = vmatprep.subr.bf16.mxu0 %v1256_v40 }
  0x9b   : > { %1117 = vmatpush3.bf16.msra.mxu1 %v1291_v52 }
  0x9c   : > { %649 = vmatpush1.bf16.msra.mxu0 %v1258_v45  ;;  %1118 = vmatprep.subr.bf16.mxu1 %v1292_v54 }
  0x9d   : > { %650 = vmatprep.subr.bf16.mxu0 %v1262_v47 }
  0x9f   : > { %1119 = vmatpush3.bf16.msra.mxu1 %v1293_v56 }
  0xa0   : > { %651 = vmatpush1.bf16.msra.mxu0 %v1264_v49  ;;  %1120 = vmatprep.subr.bf16.mxu1 %v1294_v61 }
  0xa1   : > { %652 = vmatprep.subr.bf16.mxu0 %v1268_v51 }
  0xa3   : > { %1121 = vmatpush3.bf16.msra.mxu1 %v1295_v62 }
  0xa4   : > { %653 = vmatpush1.bf16.msra.mxu0 %v1270_v53  ;;  %1122 = vmatprep.subr.bf16.mxu1 %v1296_v63 }
  0xa5   : > { %654 = vmatprep.subr.bf16.mxu0 %v1274_v55 }
  0xa7   : > { %1123 = vmatpush3.bf16.msra.mxu1 %v1297_v0 }
  0xa8   : > { %655 = vmatpush1.bf16.msra.mxu0 %v1276_v57  ;;  %1124 = vmatprep.subr.bf16.mxu1 %v1298_v1 }
  0xa9   : > { %656 = vmatprep.subr.bf16.mxu0 %v1280_v58 }
  0xab   : > { %1125 = vmatpush3.bf16.msra.mxu1 %v1299_v2 }
  0xac   : > { %657 = vmatpush1.bf16.msra.mxu0 %v1282_v59  ;;  %1126 = vmatprep.subr.bf16.mxu1 %v1300_v3 }
  0xaf   : > { %659 = vmatmul.mubr.bf16.vlgmr.msra.gmra.mrb[0].mxu0 %v1039_v60  ;;  %1127 = vmatpush3.bf16.msra.mxu1 %v1301_v4 }
 0x165   : > { %v701_v5 = vpop.f32.mrb[0].mxu1 }
 0x166   : > { %v703_v6 = vpop.f32.mrb[1].mxu1 }
 0x167   : > { %v705_v7 = vpop.f32.mrb[2].mxu1 }
 0x168   : > { %v706_v8 = vpop.f32.mrb[3].mxu1 }
 0x182   : > { %v660_v16 = vpop.f32.mrb[0].mxu0 }
 0x183   : > { %v702_v18 = vadd.f32 %v701_v5, %v660_v16  ;;  %v662_v20 = vpop.f32.mrb[1].mxu0 }
 0x184   : > { %v704_v21 = vadd.f32 %v703_v6, %v662_v20  ;;  %v664_v23 = vpop.f32.mrb[2].mxu0 }
 0x185   : > { %v720_v24 = vmul.f32 %v713_v15, %v702_v18  ;;  %v665_v25 = vpop.f32.mrb[3].mxu0 }
 0x186   : > { %v721_v26 = vmul.f32 %v717_v17, %v704_v21 }
 0x187   : > { %v734_v27 = vadd.f32 %v727_v19, %v720_v24 }
 0x188   : > { %v735_v28 = vadd.f32 %v731_v22, %v721_v26 }
 0x189   : > { %v736_v29 = vmax.f32 %v734_v27, 0.0 }
 0x18a   : > { %v737_v30 = vmax.f32 %v735_v28, 0.0 }
 0x18b   : > { %v738_v32 = vpack.c.bf16 %v736_v29, %v736_v29 }
 0x18c   : > { %v739_v31 = vpack.c.bf16 %v737_v30, %v737_v30 }
 0x18e   : > { %900 = vmatprep.mubr.bf16.mxu1 %v739_v31 }
 0x18f   : > { %901 = vmatmul.mubr.bf16.vlgmr.msra.gmra.mrb[4].mxu1 %v738_v32 }
 0x262   : > { %v1128_v33 = vpop.f32.mrb[4].mxu1 }
 0x263   : > { %v1129_v34 = vpop.f32.mrb[5].mxu1 }
 0x264   : > { %v1130_v36 = vadd.f32 %v1129_v34, %v1128_v33  ;;  %v1131_v37 = vpop.f32.mrb[6].mxu1 }
 0x265   : > { %v1132_v39 = vpop.f32.mrb[7].mxu1 }
 0x266   : > { %v915_v40 = vmul.f32 %v1130_v36, %v1106_v35 }
 0x268   : > { %v923_v41 = vadd.f32 %v1107_v38, %v915_v40 }
 0x26a   : > { %v924_v42 = vmax.f32 %v923_v41, 0.0 }
 0x26c   : > { %925 = vst [vmem:[%s323_s1] sm:$0xff] %v924_v42 }
 0x26d   : > { %1401 = shalt.err (!%p1398_p2)
}
 0x26e   : > { %s1402_s15 = scalar_lea.hbm %s1711_s30, 128  ;;  %s1406_s12 = scalar_lea.hbm %s1762_s7, 256 }
 0x26f   : > { %p1403_p13 = scmp.ne.s32.totalorder %s1711_s30, %s1402_s15  ;;  %p1407_p4 = scmp.lt.u32.totalorder %s1711_s30, %s1762_s7 }
 0x270   : > { %p1408_p7 = scmp.lt.u32.totalorder %s1406_s12, %s1402_s15  ;;  %p1410_p11 = scmp.lt.u32.totalorder %s1402_s15, %s1711_s30 }
 0x271   : > { %p1404_p6 = pnand %p1403_p13, %p1778_p0 }
 0x272   : > { %p1409_p8 = por %p1408_p7, %p1407_p4 }
 0x273   : > { %p1405_p10 = pneg %p1404_p6 }
 0x274   : > { %p1411_p1 = por %p1410_p11, %p1409_p8 }
 0x276   : > { %p1412_p3 = pnand %p1411_p1, %p1405_p10 }
 0x278   : > { %1415 = shalt.err (!%p1412_p3)
}
 0x279   : > { %1149 = dma.vmem_to_hbm [thread:$0]  (%p1778_p0), %s1713_s16, 128, %s1711_s30, %s927_s9  }
 0x27a PF: > { %s952_s1 = sand.u32 1, %s1446_s24   ;;  %p1779_p5 = scmp.ne.s32.totalorder %s1768_s8, 0 }
 0x27b   : > { %p1780_p9 = scmp.ge.s32.totalorder %s1458_s27, 2  ;;  %s953_s14 = scalar_lea.sflag [#allocation4], %s952_s1 }
 0x27d   : > { %p1163_p12 = pnand %p1780_p9, %p1779_p5 }
 0x27f   : > { %1441 = dma.done.wait (!%p1163_p12), %s953_s14, 128  }
 0x280   : > { %1443 = vsyncadd (!%p1163_p12), %s953_s14, 4294967168  ;;  %p21_p2 = scmp.ge.s32.totalorder %s1619_s13, 4   ;;  %s1781_s24 = smov %s1450_s25 }
 0x281   : > { %s1782_s25 = smov %s1454_s26  ;;  %s1783_s26 = smov %s1628_s17 }
 0x282   : > { %s1784_s27 = smov %s1619_s13  ;;  %23 = sbr.rel (!%p21_p2) target bundleno = 8 (0x8), region = 101 }
 0x289   :  { %958 = vsyncpa [#allocation3], 1 }
 0x28a   :  { %960 = vsyncpa [#allocation3 + $0x1], 1 }
 0x28b   :  { %961 = vsyncpa [#allocation6], 1 }
 0x28c   :  { %962 = vsyncpa [#allocation4], 1 }
 0x28d   :  { %964 = vsyncpa [#allocation4 + $0x1], 1 }

</bundles_post_ra>
